<compile_context>
chip_gen: v5e
topology: v5e:2x2
jax: 0.10.0
libtpu: 0.0.40
codegen_flags: <defaults>
</compile_context>

<pallas_src>
import functools

import jax
import jax.numpy as jnp
from jax.experimental import pallas as pl
from jax.experimental.pallas import tpu as pltpu

_LANES = 128
_SUBLANES = 8


def _target_step_bytes() -> int:
    """HBM bytes fetched per grid step (all 3 inputs, single buffer)."""
    try:
        kind = jax.devices()[0].device_kind.lower()
    except Exception:  # pragma: no cover - defensive; fall back to conservative size
        kind = ""
    if "v7" in kind or "7x" in kind:
        return 12 << 20  # ~4 MiB/input at f32: hide the ~0.35us/step cost at 3.2 TB/s
    return 6 << 20       # ~2 MiB/input at f32: already near roofline on v5e / v6e


def _wsd_kernel(x_ref, t_ref, w_ref, o_ref, *, n, d, bn, tr, nb_b, nb_r,
                need_row_mask, need_col_mask):
    x = x_ref[...].astype(jnp.float32)   # logits
    t = t_ref[...].astype(jnp.float32)   # labels
    w = w_ref[...].astype(jnp.float32)   # weights

    # sigmoid: exp on the EUP, approx reciprocal also on the EUP -> VALU slot stays free.
    p = pl.reciprocal(1.0 + jnp.exp(-x), approx=True)
    w2 = w * w
    wp = w2 * p          # w^2 * p
    wt = w2 * t          # w^2 * t
    wi = wp * t          # w^2 * p * t

    def reduce_and_store(a, b, c):
        # (bn, tr, 128) --sum over reduce rows--> (bn, 128); one fused lane-dense store.
        o_ref[0] = jnp.concatenate(
            [jnp.sum(a, axis=1), jnp.sum(b, axis=1), jnp.sum(c, axis=1)], axis=-1)

    if not (need_row_mask or need_col_mask):
        reduce_and_store(wi, wp, wt)
        return

    bi = pl.program_id(0)
    rj = pl.program_id(1)
    conds = []
    if need_row_mask:
        conds.append(bi == nb_b - 1)
    if need_col_mask:
        conds.append(rj == nb_r - 1)
    is_tail = conds[0]
    for cnd in conds[1:]:
        is_tail = jnp.logical_or(is_tail, cnd)

    @pl.when(jnp.logical_not(is_tail))
    def _():
        reduce_and_store(wi, wp, wt)

    @pl.when(is_tail)
    def _():
        shape = (bn, tr, _LANES)
        valid = None
        if need_col_mask:
            col = (rj * tr + jax.lax.broadcasted_iota(jnp.int32, shape, 1)) * _LANES \
                  + jax.lax.broadcasted_iota(jnp.int32, shape, 2)
            valid = col < d
        if need_row_mask:
            row_ok = (bi * bn + jax.lax.broadcasted_iota(jnp.int32, shape, 0)) < n
            valid = row_ok if valid is None else jnp.logical_and(valid, row_ok)
        # Select (not multiply): garbage/NaN in the out-of-bounds tail must not survive.
        reduce_and_store(jnp.where(valid, wi, 0.0),
                         jnp.where(valid, wp, 0.0),
                         jnp.where(valid, wt, 0.0))


def weighted_soft_dice_loss(logits, labels, weights, *, max_block_elems=None):
    """Pallas TPU implementation of WeightedSoftDiceLoss.forward.  Returns scalar f32."""
    n = logits.shape[0]
    x = jnp.reshape(logits, (n, -1))
    t = jnp.reshape(labels, (n, -1))
    w = jnp.reshape(weights, (n, -1))
    if t.dtype == jnp.bool_:
        t = t.astype(jnp.uint8)
    d = x.shape[1]

    r = pl.cdiv(d, _LANES)
    pad = r * _LANES - d
    if pad:
        # TODO(synk): only when d % 128 != 0 — pads <128 elems/sample (one HBM copy)
        # purely so the (n, d) -> (n, r, 128) view stays a free bitcast; the padded
        # tail is nullified by the in-kernel mask, so pad values are irrelevant.
        x = jnp.pad(x, ((0, 0), (0, pad)))
        t = jnp.pad(t, ((0, 0), (0, pad)))
        w = jnp.pad(w, ((0, 0), (0, pad)))
    x = x.reshape(n, r, _LANES)
    t = t.reshape(n, r, _LANES)
    w = w.reshape(n, r, _LANES)

    bytes_per_elem = x.dtype.itemsize + t.dtype.itemsize + w.dtype.itemsize
    if max_block_elems is None:
        max_block_elems = max(_SUBLANES * _LANES, _target_step_bytes() // bytes_per_elem)
    rows_budget = max(_SUBLANES, max_block_elems // _LANES)   # number of (.,128) rows/block

    # Pick (bn, tr): keep every block within budget, keep the last-two block dims legal
    # (tr multiple of 8 or == r; out block's bn multiple of 8 or == n), and tile the
    # batch dimension too when n is large so VMEM never blows up.
    if n * r <= rows_budget:
        bn, tr = n, r                                    # one block covers everything
    elif n > _SUBLANES and r * _SUBLANES <= rows_budget:
        bn = max(_SUBLANES, min(n, (rows_budget // r) // _SUBLANES * _SUBLANES))
        tr = r                                           # batch-tiled, full reduce axis
    else:
        bn = n if n <= _SUBLANES else _SUBLANES
        per = max(_SUBLANES, rows_budget // bn)
        tr = r if per >= r else (per // _SUBLANES) * _SUBLANES   # reduce-axis tiled

    nb_b = pl.cdiv(n, bn)
    nb_r = pl.cdiv(r, tr)
    need_row_mask = (nb_b * bn != n)
    need_col_mask = (nb_r * tr * _LANES != d)

    step_in_bytes = bn * tr * _LANES * bytes_per_elem
    out_block_bytes = bn * 3 * _LANES * 4
    vmem_need = 2 * (step_in_bytes + out_block_bytes)            # double-buffered
    vmem_limit = int(min(56 << 20, max(32 << 20, vmem_need + (16 << 20))))

    kernel = functools.partial(
        _wsd_kernel, n=n, d=d, bn=bn, tr=tr, nb_b=nb_b, nb_r=nb_r,
        need_row_mask=need_row_mask, need_col_mask=need_col_mask)

    in_spec = pl.BlockSpec((bn, tr, _LANES), lambda bi, rj: (bi, rj, 0))
    out_spec = pl.BlockSpec((1, bn, 3 * _LANES), lambda bi, rj: (rj, bi, 0))

    parts = pl.pallas_call(
        kernel,
        out_shape=jax.ShapeDtypeStruct((nb_r, n, 3 * _LANES), jnp.float32),
        grid_spec=pltpu.PrefetchScalarGridSpec(
            num_scalar_prefetch=0,
            grid=(nb_b, nb_r),
            in_specs=[in_spec, in_spec, in_spec],
            out_specs=out_spec,
        ),
        compiler_params=pltpu.CompilerParams(
            dimension_semantics=("parallel", "parallel"),
            vmem_limit_bytes=vmem_limit,
        ),
    )(x, t, w)

    # Tiny cross-block / cross-lane combine + dice formula in plain JAX.
    a = jnp.sum(parts[:, :, 0 * _LANES:1 * _LANES], axis=(0, 2))   # sum_j w^2*p*t
    b = jnp.sum(parts[:, :, 1 * _LANES:2 * _LANES], axis=(0, 2))   # sum_j w^2*p
    c = jnp.sum(parts[:, :, 2 * _LANES:3 * _LANES], axis=(0, 2))   # sum_j w^2*t
    score = 2.0 * (a + 1.0) / (b + c + 1.0)
    return 1.0 - jnp.sum(score) / jnp.float32(n)


def _reference(logits, labels, weights):
    num = logits.shape[0]
    probs = jax.nn.sigmoid(logits.astype(jnp.float32))
    w = weights.reshape(num, -1).astype(jnp.float32)
    w2 = w * w
    m1 = probs.reshape(num, -1)
    m2 = labels.reshape(num, -1).astype(jnp.float32)
    inter = m1 * m2
    score = 2.0 * ((w2 * inter).sum(1) + 1.0) / ((w2 * m1).sum(1) + (w2 * m2).sum(1) + 1.0)
    return 1.0 - score.sum() / num


def _check(logits, labels, weights, **kw):
    out = jax.block_until_ready(weighted_soft_dice_loss(logits, labels, weights, **kw))
    ref = jax.block_until_ready(_reference(logits, labels, weights))
    # approx-reciprocal sigmoid => compare at loss-scalar precision
    assert jnp.allclose(out, ref, rtol=2e-3, atol=2e-3), (out, ref)
    return out


if __name__ == "__main__":
    key = jax.random.PRNGKey(0)
    k1, k2, k3 = jax.random.split(key, 3)

    # 1) NCHW f32 segmentation-style inputs, d % 128 == 0 -> zero-copy fast path.
    shape = (2, 4, 16, 16)
    logits = jax.random.normal(k1, shape, dtype=jnp.float32)
    labels = (jax.random.uniform(k2, shape) > 0.5).astype(jnp.float32)
    weights = jax.random.uniform(k3, shape, dtype=jnp.float32)
    _check(logits, labels, weights)

    # 2) Narrow HBM dtypes (bf16 logits/weights, uint8 labels) + ragged d (in-kernel mask).
    shape2 = (2, 3, 15, 17)
    logits2 = jax.random.normal(k1, shape2, dtype=jnp.float32).astype(jnp.bfloat16)
    labels2 = (jax.random.uniform(k2, shape2) > 0.5).astype(jnp.uint8)
    weights2 = jax.random.uniform(k3, shape2, dtype=jnp.float32).astype(jnp.bfloat16)
    _check(logits2, labels2, weights2)

    # 3) Force batch + reduce-axis tiling and both tail masks via a tiny block budget.
    shape3 = (10, 1, 16, 127)
    logits3 = jax.random.normal(k1, shape3, dtype=jnp.float32)
    labels3 = (jax.random.uniform(k2, shape3) > 0.5).astype(jnp.float32)
    weights3 = jax.random.uniform(k3, shape3, dtype=jnp.float32)
    _check(logits3, labels3, weights3, max_block_elems=_SUBLANES * _SUBLANES * _LANES)

    print("KERNEL_OK")
</pallas_src>

<mosaic_0001>
module attributes {stable_mosaic.version = 11 : i64} {
  func.func @_wsd_kernel(%arg0: i32, %arg1: i32, %arg2: memref<2x8x128xf32, #tpu.memory_space<vmem>>, %arg3: memref<2x8x128xf32, #tpu.memory_space<vmem>>, %arg4: memref<2x8x128xf32, #tpu.memory_space<vmem>>, %arg5: memref<1x2x384xf32, #tpu.memory_space<vmem>>) attributes {dimension_semantics = [#tpu.dimension_semantics<parallel>, #tpu.dimension_semantics<parallel>], iteration_bounds = array<i64: 1, 1>, scalar_prefetch = 0 : i64, scratch_operands = 0 : i64, tpu.core_type = #tpu.core_type<tc>, window_params = [{transform_indices = @transform_0, window_bounds = array<i64: 2, 8, 128>}, {transform_indices = @transform_1, window_bounds = array<i64: 2, 8, 128>}, {transform_indices = @transform_2, window_bounds = array<i64: 2, 8, 128>}, {transform_indices = @transform_3, window_bounds = array<i64: 1, 2, 384>}]} {
    %c0 = arith.constant 0 : index
    %c0_0 = arith.constant 0 : index
    %c0_1 = arith.constant 0 : index
    %0 = vector.load %arg2[%c0, %c0_0, %c0_1] : memref<2x8x128xf32, #tpu.memory_space<vmem>>, vector<2x8x128xf32>
    %c0_2 = arith.constant 0 : index
    %c0_3 = arith.constant 0 : index
    %c0_4 = arith.constant 0 : index
    %1 = vector.load %arg3[%c0_2, %c0_3, %c0_4] : memref<2x8x128xf32, #tpu.memory_space<vmem>>, vector<2x8x128xf32>
    %c0_5 = arith.constant 0 : index
    %c0_6 = arith.constant 0 : index
    %c0_7 = arith.constant 0 : index
    %2 = vector.load %arg4[%c0_5, %c0_6, %c0_7] : memref<2x8x128xf32, #tpu.memory_space<vmem>>, vector<2x8x128xf32>
    %cst = arith.constant 0.000000e+00 : f32
    %3 = vector.broadcast %cst : f32 to vector<2x8x128xf32>
    %4 = arith.subf %3, %0 : vector<2x8x128xf32>
    %5 = math.exp %4 : vector<2x8x128xf32>
    %cst_8 = arith.constant 1.000000e+00 : f32
    %6 = vector.broadcast %cst_8 : f32 to vector<2x8x128xf32>
    %7 = arith.addf %6, %5 : vector<2x8x128xf32>
    %8 = tpu.reciprocal %7 {approx = true} : vector<2x8x128xf32> -> vector<2x8x128xf32>
    %9 = arith.mulf %2, %2 : vector<2x8x128xf32>
    %10 = arith.mulf %9, %8 : vector<2x8x128xf32>
    %11 = arith.mulf %9, %1 : vector<2x8x128xf32>
    %12 = arith.mulf %10, %1 : vector<2x8x128xf32>
    %cst_9 = arith.constant dense<0.000000e+00> : vector<2x128xf32>
    %13 = vector.multi_reduction <add>, %12, %cst_9 [1] : vector<2x8x128xf32> to vector<2x128xf32>
    %cst_10 = arith.constant dense<0.000000e+00> : vector<2x128xf32>
    %14 = vector.multi_reduction <add>, %10, %cst_10 [1] : vector<2x8x128xf32> to vector<2x128xf32>
    %cst_11 = arith.constant dense<0.000000e+00> : vector<2x128xf32>
    %15 = vector.multi_reduction <add>, %11, %cst_11 [1] : vector<2x8x128xf32> to vector<2x128xf32>
    %16 = tpu.concatenate %13, %14, %15 in 1 : vector<2x128xf32>, vector<2x128xf32>, vector<2x128xf32> -> vector<2x384xf32>
    %c0_12 = arith.constant 0 : index
    %c0_13 = arith.constant 0 : index
    %c0_14 = arith.constant 0 : index
    %17 = vector.load %arg5[%c0_12, %c0_13, %c0_14] : memref<1x2x384xf32, #tpu.memory_space<vmem>>, vector<1x2x384xf32>
    %18 = vector.shape_cast %17 : vector<1x2x384xf32> to vector<2x384xf32>
    %19 = vector.shape_cast %16 : vector<2x384xf32> to vector<1x2x384xf32>
    tpu.vector_store %arg5[%c0_12, %c0_13, %c0_14], %19 {strides = array<i32>} : memref<1x2x384xf32, #tpu.memory_space<vmem>>, vector<1x2x384xf32>,
    return
  }
  func.func @transform_0(%arg0: i32, %arg1: i32) -> (i32, i32, i32) {
    %c0_i32 = arith.constant 0 : i32
    %c0_i32_0 = arith.constant 0 : i32
    return %arg0, %arg1, %c0_i32 : i32, i32, i32
  }
  func.func @transform_1(%arg0: i32, %arg1: i32) -> (i32, i32, i32) {
    %c0_i32 = arith.constant 0 : i32
    %c0_i32_0 = arith.constant 0 : i32
    return %arg0, %arg1, %c0_i32 : i32, i32, i32
  }
  func.func @transform_2(%arg0: i32, %arg1: i32) -> (i32, i32, i32) {
    %c0_i32 = arith.constant 0 : i32
    %c0_i32_0 = arith.constant 0 : i32
    return %arg0, %arg1, %c0_i32 : i32, i32, i32
  }
  func.func @transform_3(%arg0: i32, %arg1: i32) -> (i32, i32, i32) {
    %c0_i32 = arith.constant 0 : i32
    %c0_i32_0 = arith.constant 0 : i32
    return %arg1, %arg0, %c0_i32 : i32, i32, i32
  }
}

</mosaic_0001>

<bundles_post_ra>
// kernel: tpu_custom_call.1
= control target key start
LH: loop header
LB: loop body
LE: loop exit
PB: predicated region body
PF: predicated region fallthrough
CT: control target
= control target key end

     0   :  { %8 = vsyncpa [#allocation3], 0  ;;  %s315_s0 = inlined_call_operand.hbm [shape: f32[2,8,128], index: 0, kind: input, shape index: {}]   ;;  %s316_s1 = inlined_call_operand.hbm [shape: f32[2,8,128], index: 1, kind: input, shape index: {}]   ;;  %s317_s2 = inlined_call_operand.hbm [shape: f32[2,8,128], index: 2, kind: input, shape index: {}]   ;;  %s318_s3 = inlined_call_operand.hbm [shape: f32[1,2,384], index: 3, kind: output, shape index: {}]  }
   0x1   :  { %9 = vsyncpa [#allocation6], 0 }
   0x2   :  { %10 = vsyncpa [#allocation4], 0  ;;  %s28_s14 = sshll.u32 %s316_s1, 4  ;;  %s274_s15 = smov [#allocation5]   ;;  %s29_s14 = int_to_ptr.hbm [resolvable:$true] %s28_s14 }
   0x3   :  { %s30_s16 = sshll.u32 %s274_s15, 4  ;;  %s15_s19 = sshll.u32 %s315_s0, 4  ;;  %s31_s16 = int_to_ptr.vmem [resolvable:$true] %s30_s16  ;;  %s16_s19 = int_to_ptr.hbm [resolvable:$true] %s15_s19 }
   0x4   :  { %s275_s20 = smov 128   ;;  %s276_s21 = smov 8  }
   0x5   :  { %36 = dma.hbm_to_vmem [thread:$0]  %s29_s14, 256, %s31_s16, [#allocation6], %s275_s20, %s275_s20, %s276_s21  }
   0x6   :  { %s277_s22 = smov [#allocation2]   ;;  %s41_s26 = sshll.u32 %s317_s2, 4  ;;  %s42_s26 = int_to_ptr.hbm [resolvable:$true] %s41_s26 }
   0x7   :  { %s17_s23 = sshll.u32 %s277_s22, 4  ;;  %s278_s1 = smov [#allocation7]   ;;  %s18_s23 = int_to_ptr.vmem [resolvable:$true] %s17_s23 }
   0x8   :  { %23 = dma.hbm_to_vmem [thread:$0]  %s16_s19, 256, %s18_s23, [#allocation3], %s275_s20, %s275_s20, %s276_s21  }
   0x9   :  { %s43_s27 = sshll.u32 %s278_s1, 4  ;;  %s44_s27 = int_to_ptr.vmem [resolvable:$true] %s43_s27 }
   0xa   :  { %49 = dma.hbm_to_vmem [thread:$0]  %s42_s26, 256, %s44_s27, [#allocation6], %s275_s20, %s275_s20, %s276_s21  }
   0xb   :  { %268 = dma.done.wait [#allocation3], 256  }
   0xc   :  { %269 = vsyncadd [#allocation3], 4294967040 }
   0xd   :  { %270 = dma.done.wait [#allocation6], 512  }
   0xe   :  { %271 = vsyncadd [#allocation6], 4294966784  ;;  %v62_v0 = vld [vmem:[#allocation2] sm:$0xff]  ;;  %v63_v1 = vld [vmem:[#allocation2 + $0x8] sm:$0xff]  ;;  %vm124_vm0 = vcmask 1041409   ;;  %vm134_vm1 = vcmask 1041408  }
   0xf   :  { %v66_v2 = vld [vmem:[#allocation7] sm:$0xff]  ;;  %v67_v3 = vld [vmem:[#allocation7 + $0x8] sm:$0xff]  ;;  %v68_v4 = vsub.f32 0.0, %v62_v0  ;;  %v69_v5 = vsub.f32 0.0, %v63_v1  ;;  %v64_v6 = vld [vmem:[#allocation5] sm:$0xff]  ;;  %s279_s0 = smov [#allocation8]  }
  0x10   :  { %v65_v7 = vld [vmem:[#allocation5 + $0x8] sm:$0xff]  ;;  %v78_v8 = vmul.f32 %v66_v2, %v66_v2  ;;  %v79_v9 = vmul.f32 %v67_v3, %v67_v3  ;;  %s145_s2 = sshll.u32 %s279_s0, 4  ;;  %s147_s30 = sshll.u32 %s318_s3, 4  ;;  %vm136_vm2 = vcmask 1043456   ;;  %s146_s2 = int_to_ptr.vmem [resolvable:$true] %s145_s2  ;;  %s148_s30 = int_to_ptr.hbm [resolvable:$true] %s147_s30 }
  0x11   :  { %v70_v10 = vmul.f32 1.442695, %v68_v4  ;;  %v72_v11 = vmul.f32 1.442695, %v69_v5 }
  0x12   :  { %v82_v12 = vmul.f32 %v78_v8, %v64_v6  ;;  %v83_v13 = vmul.f32 %v79_v9, %v65_v7 }
  0x13   :  { %164 = vpow2.f32 %v70_v10 }
  0x14   :  { %166 = vpow2.f32 %v72_v11  ;;  %v110_v14 = vrot.slane %v82_v12, 4  ;;  %v116_v15 = vrot.slane %v83_v13, 4 }
  0x16   :  { %v111_v20 = vadd.f32 %v110_v14, %v82_v12  ;;  %v117_v21 = vadd.f32 %v116_v15, %v83_v13 }
  0x18   :  { %v112_v22 = vrot.slane %v111_v20, 2  ;;  %v118_v23 = vrot.slane %v117_v21, 2 }
  0x19   :  { %v165_v16 = vpop.eup %164 }
  0x1a   :  { %v167_v17 = vpop.eup %166  ;;  %v74_v18 = vadd.f32 1.0, %v165_v16  ;;  %v113_v27 = vadd.f32 %v112_v22, %v111_v20  ;;  %v119_v28 = vadd.f32 %v118_v23, %v117_v21 }
  0x1b   :  { %v75_v19 = vadd.f32 1.0, %v167_v17 }
  0x1c   :  { %168 = vrcp.f32 %v74_v18  ;;  %v114_v36 = vrot.slane %v113_v27, 1  ;;  %v120_v37 = vrot.slane %v119_v28, 1 }
  0x1d   :  { %170 = vrcp.f32 %v75_v19 }
  0x1e   :  { %v115_v46 = vadd.f32 %v114_v36, %v113_v27  ;;  %v121_v47 = vadd.f32 %v120_v37, %v119_v28 }
  0x20   :  { %v131_v56 = vsel %vm124_vm0, %v121_v47, %v115_v46 }
  0x21   :  { %v133_v62 = vrot.slane %v131_v56, 4 }
  0x22   :  { %v169_v24 = vpop.eup %168 }
  0x23   :  { %v171_v25 = vpop.eup %170  ;;  %v80_v26 = vmul.f32 %v169_v24, %v78_v8 }
  0x24   :  { %v81_v29 = vmul.f32 %v171_v25, %v79_v9 }
  0x25   :  { %v84_v30 = vmul.f32 %v80_v26, %v64_v6  ;;  %v98_v31 = vrot.slane %v80_v26, 4 }
  0x26   :  { %v85_v32 = vmul.f32 %v81_v29, %v65_v7  ;;  %v104_v33 = vrot.slane %v81_v29, 4 }
  0x27   :  { %v86_v34 = vrot.slane %v84_v30, 4  ;;  %v99_v35 = vadd.f32 %v98_v31, %v80_v26 }
  0x28   :  { %v92_v38 = vrot.slane %v85_v32, 4  ;;  %v105_v39 = vadd.f32 %v104_v33, %v81_v29 }
  0x29   :  { %v87_v40 = vadd.f32 %v86_v34, %v84_v30  ;;  %v100_v41 = vrot.slane %v99_v35, 2 }
  0x2a   :  { %v93_v42 = vadd.f32 %v92_v38, %v85_v32  ;;  %v106_v43 = vrot.slane %v105_v39, 2 }
  0x2b   :  { %v88_v44 = vrot.slane %v87_v40, 2  ;;  %v101_v45 = vadd.f32 %v100_v41, %v99_v35 }
  0x2c   :  { %v94_v48 = vrot.slane %v93_v42, 2  ;;  %v107_v49 = vadd.f32 %v106_v43, %v105_v39 }
  0x2d   :  { %v89_v50 = vadd.f32 %v88_v44, %v87_v40  ;;  %v102_v51 = vrot.slane %v101_v45, 1 }
  0x2e   :  { %v95_v52 = vadd.f32 %v94_v48, %v93_v42  ;;  %v108_v53 = vrot.slane %v107_v49, 1 }
  0x2f   :  { %v90_v54 = vrot.slane %v89_v50, 1  ;;  %v103_v55 = vadd.f32 %v102_v51, %v101_v45 }
  0x30   :  { %v96_v57 = vrot.slane %v95_v52, 1  ;;  %v109_v58 = vadd.f32 %v108_v53, %v107_v49 }
  0x31   :  { %v91_v59 = vadd.f32 %v90_v54, %v89_v50 }
  0x32   :  { %v97_v60 = vadd.f32 %v96_v57, %v95_v52  ;;  %v128_v61 = vsel %vm124_vm0, %v109_v58, %v103_v55 }
  0x33   :  { %v132_v63 = vrot.slane %v128_v61, 6 }
  0x34   :  { %v125_v0 = vsel %vm124_vm0, %v97_v60, %v91_v59 }
  0x35   :  { %v135_v1 = vsel %vm134_vm1, %v125_v0, %v132_v63 }
  0x36   :  { %v137_v2 = vsel %vm136_vm2, %v135_v1, %v133_v62 }
  0x37   :  { %139 = vst [vmem:[#allocation8] sm:$0x3f] %v137_v2 }
  0x38   :  { %150 = dma.vmem_to_hbm [thread:$0]  %s146_s2, 96, %s148_s30, [#allocation4]  }
  0x39   :  { %272 = dma.done.wait [#allocation4], 96  }
  0x3a   :  { %273 = vsyncadd [#allocation4], 4294967200 }
  0x3b   :  { %155 = vsyncpa [#allocation3], 1 }
  0x3c   :  { %156 = vsyncpa [#allocation6], 1 }
  0x3d   :  { %157 = vsyncpa [#allocation4], 1 }

</bundles_post_ra>
